<compile_context>
chip_gen: v5e
topology: v5e:2x2
jax: 0.10.0
libtpu: 0.0.40
codegen_flags: <defaults>
</compile_context>

<pallas_src>
import functools
import math

import jax
import jax.numpy as jnp
from jax.experimental import pallas as pl
from jax.experimental.pallas import tpu as pltpu


def _round_up(x, m):
    return ((x + m - 1) // m) * m


# ---------------------------------------------------------------------------
# Kernel body: one batch tile (TB, S_pad) -> (TB, A_pad), weights resident.
# ---------------------------------------------------------------------------
def dqn_mlp_kernel(x_ref, w1_ref, b1_ref, w2_ref, b2_ref, w3_ref, b3_ref, o_ref):
    x = x_ref[...]
    h1 = jnp.dot(x, w1_ref[...], preferred_element_type=jnp.float32) + b1_ref[...]
    h1 = jnp.maximum(h1, 0.0)
    h2 = jnp.dot(h1, w2_ref[...], preferred_element_type=jnp.float32) + b2_ref[...]
    h2 = jnp.maximum(h2, 0.0)
    out = jnp.dot(h2, w3_ref[...], preferred_element_type=jnp.float32) + b3_ref[...]
    o_ref[...] = out.astype(o_ref.dtype)


# ---------------------------------------------------------------------------
# Wrapper: pads batch/state, builds the batch grid, slices the logical output.
# ---------------------------------------------------------------------------
@functools.partial(jax.jit, static_argnames=("taille_action", "block_batch"))
def dqn_forward(x, padded_params, *, taille_action, block_batch=256):
    w1, b1, w2, b2, w3, b3 = padded_params
    B, S = x.shape
    S_pad, H_pad = w1.shape
    A_pad = w3.shape[1]

    # Batch tile: at most `block_batch`, at least sublane-aligned (multiple of 8).
    TB = min(block_batch, _round_up(B, 8))
    B_pad = _round_up(B, TB)

    # Zero-pad batch rows and state columns (exact: padded rows are discarded,
    # padded state columns hit zero rows of W1).
    x_p = jnp.zeros((B_pad, S_pad), jnp.float32).at[:B, :S].set(x.astype(jnp.float32))

    grid = (pl.cdiv(B_pad, TB),)

    in_specs = [
        pl.BlockSpec((TB, S_pad), lambda i: (i, 0)),      # x: tiled over batch
        pl.BlockSpec((S_pad, H_pad), lambda i: (0, 0)),   # W1: resident
        pl.BlockSpec((1, H_pad), lambda i: (0, 0)),       # b1: resident
        pl.BlockSpec((H_pad, H_pad), lambda i: (0, 0)),   # W2: resident
        pl.BlockSpec((1, H_pad), lambda i: (0, 0)),       # b2: resident
        pl.BlockSpec((H_pad, A_pad), lambda i: (0, 0)),   # W3: resident
        pl.BlockSpec((1, A_pad), lambda i: (0, 0)),       # b3: resident
    ]
    out_specs = pl.BlockSpec((TB, A_pad), lambda i: (i, 0))  # lane-dense (128-wide) output

    out_padded = pl.pallas_call(
        dqn_mlp_kernel,
        out_shape=jax.ShapeDtypeStruct((B_pad, A_pad), jnp.float32),
        grid_spec=pltpu.PrefetchScalarGridSpec(
            num_scalar_prefetch=0,
            grid=grid,
            in_specs=in_specs,
            out_specs=out_specs,
        ),
        compiler_params=pltpu.CompilerParams(
            dimension_semantics=("parallel",),
        ),
    )(x_p, w1, b1, w2, b2, w3, b3)

    # Slice back to the logical (B, taille_action) result.
    return out_padded[:B, :taille_action]


# ---------------------------------------------------------------------------
# Parameter init (mirrors torch.nn.Linear default U(-1/sqrt(fan_in), +1/sqrt(fan_in)))
# and zero-padding to TPU-friendly shapes.
# ---------------------------------------------------------------------------
def init_linear(key, fan_in, fan_out):
    kw, kb = jax.random.split(key)
    bound = 1.0 / math.sqrt(fan_in)
    w = jax.random.uniform(kw, (fan_in, fan_out), jnp.float32, -bound, bound)
    b = jax.random.uniform(kb, (1, fan_out), jnp.float32, -bound, bound)
    return w, b


def init_dqn_params(key, taille_state, taille_action, hidden=24):
    k1, k2, k3 = jax.random.split(key, 3)
    w1, b1 = init_linear(k1, taille_state, hidden)
    w2, b2 = init_linear(k2, hidden, hidden)
    w3, b3 = init_linear(k3, hidden, taille_action)
    return (w1, b1, w2, b2, w3, b3)


def pad_params(params, *, lane=128, sublane=8):
    """Zero-pad logical params to lane/sublane-aligned shapes. Numerically exact."""
    w1, b1, w2, b2, w3, b3 = params
    S, H = w1.shape
    A = w3.shape[1]
    S_pad = _round_up(S, sublane)
    H_pad = _round_up(H, lane)
    A_pad = _round_up(A, lane)
    w1p = jnp.zeros((S_pad, H_pad), jnp.float32).at[:S, :H].set(w1)
    b1p = jnp.zeros((1, H_pad), jnp.float32).at[:, :H].set(b1)
    w2p = jnp.zeros((H_pad, H_pad), jnp.float32).at[:H, :H].set(w2)
    b2p = jnp.zeros((1, H_pad), jnp.float32).at[:, :H].set(b2)
    w3p = jnp.zeros((H_pad, A_pad), jnp.float32).at[:H, :A].set(w3)
    b3p = jnp.zeros((1, A_pad), jnp.float32).at[:, :A].set(b3)
    return (w1p, b1p, w2p, b2p, w3p, b3p)


def dqn_forward_ref(x, params):
    """Pure-JAX reference on the un-padded params (matches the PyTorch module)."""
    w1, b1, w2, b2, w3, b3 = params
    h1 = jnp.maximum(x @ w1 + b1, 0.0)
    h2 = jnp.maximum(h1 @ w2 + b2, 0.0)
    return h2 @ w3 + b3


if __name__ == "__main__":
    taille_state = 8
    taille_action = 4
    hidden = 24
    # Replay-buffer-sized batch so the batch grid actually has >1 tile
    # (TB=256 -> padded batch 512 -> grid=(2,)); odd size exercises padding/slicing.
    batch = 300

    key = jax.random.PRNGKey(0)
    k_params, k_x = jax.random.split(key)
    params = init_dqn_params(k_params, taille_state, taille_action, hidden)
    padded_params = pad_params(params)
    x = jax.random.normal(k_x, (batch, taille_state), jnp.float32)

    out = dqn_forward(x, padded_params, taille_action=taille_action, block_batch=256)
    out = jax.block_until_ready(out)

    ref = dqn_forward_ref(x, params)
    assert out.shape == (batch, taille_action)
    assert jnp.allclose(out, ref, atol=1e-5, rtol=1e-5)

    print("KERNEL_OK")
</pallas_src>

<mosaic_0001>
module attributes {stable_mosaic.version = 11 : i64} {
  func.func @dqn_mlp_kernel(%arg0: i32, %arg1: memref<256x8xf32, #tpu.memory_space<vmem>>, %arg2: memref<8x128xf32, #tpu.memory_space<vmem>>, %arg3: memref<1x128xf32, #tpu.memory_space<vmem>>, %arg4: memref<128x128xf32, #tpu.memory_space<vmem>>, %arg5: memref<1x128xf32, #tpu.memory_space<vmem>>, %arg6: memref<128x128xf32, #tpu.memory_space<vmem>>, %arg7: memref<1x128xf32, #tpu.memory_space<vmem>>, %arg8: memref<256x128xf32, #tpu.memory_space<vmem>>) attributes {dimension_semantics = [#tpu.dimension_semantics<parallel>], iteration_bounds = array<i64: 2>, scalar_prefetch = 0 : i64, scratch_operands = 0 : i64, tpu.core_type = #tpu.core_type<tc>, window_params = [{transform_indices = @transform_0, window_bounds = array<i64: 256, 8>}, {pipeline_mode = #tpu.pipeline_mode<synchronous>, transform_indices = @transform_1, window_bounds = array<i64: 8, 128>}, {pipeline_mode = #tpu.pipeline_mode<synchronous>, transform_indices = @transform_2, window_bounds = array<i64: 1, 128>}, {pipeline_mode = #tpu.pipeline_mode<synchronous>, transform_indices = @transform_3, window_bounds = array<i64: 128, 128>}, {pipeline_mode = #tpu.pipeline_mode<synchronous>, transform_indices = @transform_4, window_bounds = array<i64: 1, 128>}, {pipeline_mode = #tpu.pipeline_mode<synchronous>, transform_indices = @transform_5, window_bounds = array<i64: 128, 128>}, {pipeline_mode = #tpu.pipeline_mode<synchronous>, transform_indices = @transform_6, window_bounds = array<i64: 1, 128>}, {transform_indices = @transform_7, window_bounds = array<i64: 256, 128>}]} {
    %c0 = arith.constant 0 : index
    %c0_0 = arith.constant 0 : index
    %0 = vector.load %arg1[%c0, %c0_0] : memref<256x8xf32, #tpu.memory_space<vmem>>, vector<256x8xf32>
    %c0_1 = arith.constant 0 : index
    %c0_2 = arith.constant 0 : index
    %1 = vector.load %arg2[%c0_1, %c0_2] : memref<8x128xf32, #tpu.memory_space<vmem>>, vector<8x128xf32>
    %cst = arith.constant dense<0.000000e+00> : vector<256x128xf32>
    %2 = tpu.matmul %0, %1, %cst {dimension_numbers = #tpu.dot_dimension_numbers<[1], [0], [0], [1], [0, 0, 1, 1], [], []>} : vector<256x8xf32>, vector<8x128xf32>, vector<256x128xf32> -> vector<256x128xf32>
    %c0_3 = arith.constant 0 : index
    %c0_4 = arith.constant 0 : index
    %3 = vector.load %arg3[%c0_3, %c0_4] : memref<1x128xf32, #tpu.memory_space<vmem>>, vector<1x128xf32>
    %4 = vector.broadcast %3 : vector<1x128xf32> to vector<256x128xf32>
    %5 = arith.addf %2, %4 : vector<256x128xf32>
    %cst_5 = arith.constant 0.000000e+00 : f32
    %6 = vector.broadcast %cst_5 : f32 to vector<256x128xf32>
    %7 = arith.maximumf %5, %6 : vector<256x128xf32>
    %c0_6 = arith.constant 0 : index
    %c0_7 = arith.constant 0 : index
    %8 = vector.load %arg4[%c0_6, %c0_7] : memref<128x128xf32, #tpu.memory_space<vmem>>, vector<128x128xf32>
    %cst_8 = arith.constant dense<0.000000e+00> : vector<256x128xf32>
    %9 = tpu.matmul %7, %8, %cst_8 {dimension_numbers = #tpu.dot_dimension_numbers<[1], [0], [0], [1], [0, 0, 1, 1], [], []>} : vector<256x128xf32>, vector<128x128xf32>, vector<256x128xf32> -> vector<256x128xf32>
    %c0_9 = arith.constant 0 : index
    %c0_10 = arith.constant 0 : index
    %10 = vector.load %arg5[%c0_9, %c0_10] : memref<1x128xf32, #tpu.memory_space<vmem>>, vector<1x128xf32>
    %11 = vector.broadcast %10 : vector<1x128xf32> to vector<256x128xf32>
    %12 = arith.addf %9, %11 : vector<256x128xf32>
    %cst_11 = arith.constant 0.000000e+00 : f32
    %13 = vector.broadcast %cst_11 : f32 to vector<256x128xf32>
    %14 = arith.maximumf %12, %13 : vector<256x128xf32>
    %c0_12 = arith.constant 0 : index
    %c0_13 = arith.constant 0 : index
    %15 = vector.load %arg6[%c0_12, %c0_13] : memref<128x128xf32, #tpu.memory_space<vmem>>, vector<128x128xf32>
    %cst_14 = arith.constant dense<0.000000e+00> : vector<256x128xf32>
    %16 = tpu.matmul %14, %15, %cst_14 {dimension_numbers = #tpu.dot_dimension_numbers<[1], [0], [0], [1], [0, 0, 1, 1], [], []>} : vector<256x128xf32>, vector<128x128xf32>, vector<256x128xf32> -> vector<256x128xf32>
    %c0_15 = arith.constant 0 : index
    %c0_16 = arith.constant 0 : index
    %17 = vector.load %arg7[%c0_15, %c0_16] : memref<1x128xf32, #tpu.memory_space<vmem>>, vector<1x128xf32>
    %18 = vector.broadcast %17 : vector<1x128xf32> to vector<256x128xf32>
    %19 = arith.addf %16, %18 : vector<256x128xf32>
    %c0_17 = arith.constant 0 : index
    %c0_18 = arith.constant 0 : index
    %20 = vector.load %arg8[%c0_17, %c0_18] : memref<256x128xf32, #tpu.memory_space<vmem>>, vector<256x128xf32>
    tpu.vector_store %arg8[%c0_17, %c0_18], %19 {strides = array<i32>} : memref<256x128xf32, #tpu.memory_space<vmem>>, vector<256x128xf32>,
    return
  }
  func.func @transform_0(%arg0: i32) -> (i32, i32) {
    %c0_i32 = arith.constant 0 : i32
    %c0_i32_0 = arith.constant 0 : i32
    return %arg0, %c0_i32 : i32, i32
  }
  func.func @transform_1(%arg0: i32) -> (i32, i32) {
    %c0_i32 = arith.constant 0 : i32
    %c0_i32_0 = arith.constant 0 : i32
    %c0_i32_1 = arith.constant 0 : i32
    return %c0_i32, %c0_i32_0 : i32, i32
  }
  func.func @transform_2(%arg0: i32) -> (i32, i32) {
    %c0_i32 = arith.constant 0 : i32
    %c0_i32_0 = arith.constant 0 : i32
    %c0_i32_1 = arith.constant 0 : i32
    return %c0_i32, %c0_i32_0 : i32, i32
  }
  func.func @transform_3(%arg0: i32) -> (i32, i32) {
    %c0_i32 = arith.constant 0 : i32
    %c0_i32_0 = arith.constant 0 : i32
    %c0_i32_1 = arith.constant 0 : i32
    return %c0_i32, %c0_i32_0 : i32, i32
  }
  func.func @transform_4(%arg0: i32) -> (i32, i32) {
    %c0_i32 = arith.constant 0 : i32
    %c0_i32_0 = arith.constant 0 : i32
    %c0_i32_1 = arith.constant 0 : i32
    return %c0_i32, %c0_i32_0 : i32, i32
  }
  func.func @transform_5(%arg0: i32) -> (i32, i32) {
    %c0_i32 = arith.constant 0 : i32
    %c0_i32_0 = arith.constant 0 : i32
    %c0_i32_1 = arith.constant 0 : i32
    return %c0_i32, %c0_i32_0 : i32, i32
  }
  func.func @transform_6(%arg0: i32) -> (i32, i32) {
    %c0_i32 = arith.constant 0 : i32
    %c0_i32_0 = arith.constant 0 : i32
    %c0_i32_1 = arith.constant 0 : i32
    return %c0_i32, %c0_i32_0 : i32, i32
  }
  func.func @transform_7(%arg0: i32) -> (i32, i32) {
    %c0_i32 = arith.constant 0 : i32
    %c0_i32_0 = arith.constant 0 : i32
    return %arg0, %c0_i32 : i32, i32
  }
}

</mosaic_0001>

<bundles_post_ra>
// kernel: dqn_forward.1
= control target key start
LH: loop header
LB: loop body
LE: loop exit
PB: predicated region body
PF: predicated region fallthrough
CT: control target
= control target key end

     0   :  { %s1082_s24 = smov 0   ;;  %s1416_s0 = inlined_call_operand.vmem [shape: f32[512,8], index: 0, kind: input, shape index: {}]   ;;  %s1417_s1 = inlined_call_operand.vmem [shape: f32[8,128], index: 1, kind: input, shape index: {}]   ;;  %s1418_s2 = inlined_call_operand.vmem [shape: f32[1,128], index: 2, kind: input, shape index: {}]   ;;  %s1419_s3 = inlined_call_operand.vmem [shape: f32[128,128], index: 3, kind: input, shape index: {}]   ;;  %s1420_s4 = inlined_call_operand.vmem [shape: f32[1,128], index: 4, kind: input, shape index: {}]   ;;  %s1421_s5 = inlined_call_operand.vmem [shape: f32[128,128], index: 5, kind: input, shape index: {}]   ;;  %s1422_s6 = inlined_call_operand.vmem [shape: f32[1,128], index: 6, kind: input, shape index: {}]   ;;  %s1423_s7 = inlined_call_operand.vmem [shape: f32[512,128], index: 7, kind: output, shape index: {}]  }
   0x1 LB: > { %s947_s25 = sadd.s32 4294967295, %s1040_s24   ;;  %p951_p0 = scmp.ge.s32.totalorder %s1040_s24, 1  ;;  %s1040_s24 = sphi %s1082_s24, %s17_s24  }
   0x2   : > { %p238_p1 = scmp.lt.s32.totalorder %s1040_s24, 3 }
   0x4   : > { %p239_p2 = pnand %p951_p0, %p238_p1 }
   0x5   : > { %s952_s28 = sshll.u32 (!%p239_p2), %s947_s25, 5 }
   0x6   : > { %242 = sbr.rel (%p239_p2) target bundleno = 664 (0x298), region = 48  ;;  %p271_p3 = scmp.lt.s32.totalorder (!%p239_p2), %s952_s28, 63 }
   0xb   : > { %v314_v0 = vld [vmem:[%s1417_s1] sm:$0xff]  ;;  %s1425_s28 = smov (!%p271_p3, %s952_s28), 63  ;;  %vm319_vm0 = vcmask 64512   ;;  %v576_v10 = vld [vmem:[%s1419_s3 + $0x78] sm:$0xff]  ;;  %v575_v11 = vld [vmem:[%s1419_s3 + $0x70] sm:$0xff] }
   0xc   : > { %431 = vmatpush.msra.mxu0 %v314_v0  ;;  %990 = vmatpush.msra.mxu3 %v314_v0  ;;  %s953_s29 = sshll.u32 %s1425_s28, 3  ;;  %v574_v12 = vld [vmem:[%s1419_s3 + $0x68] sm:$0xff]  ;;  %v573_v14 = vld [vmem:[%s1419_s3 + $0x60] sm:$0xff]  ;;  %v572_v15 = vld [vmem:[%s1419_s3 + $0x58] sm:$0xff] }
   0xd   : > { %s1101_s9 = scalar_lea.vmem %s1416_s0, %s953_s29  ;;  %581 = vmatpush.msra.mxu1 %v576_v10  ;;  %v571_v16 = vld [vmem:[%s1419_s3 + $0x50] sm:$0xff]  ;;  %v570_v17 = vld [vmem:[%s1419_s3 + $0x48] sm:$0xff]  ;;  %v569_v19 = vld [vmem:[%s1419_s3 + $0x40] sm:$0xff] }
   0xe   : > { %v282_v1 = vld [vmem:[%s1101_s9] sm:$0xff]  ;;  %v283_v2 = vld [vmem:[%s1101_s9 + $0x8] sm:$0xff]  ;;  %v284_v3 = vld [vmem:[%s1101_s9 + $0x10] sm:$0xff]  ;;  %991 = vmatpush.msrb.mxu3 %v576_v10 }
   0xf   : > { %956 = vmatmul.msk.f32.vlgmr.msra.gmra.mxu0 %vm319_vm0, %v282_v1  ;;  %v285_v4 = vld [vmem:[%s1101_s9 + $0x18] sm:$0xff]  ;;  %v286_v5 = vld [vmem:[%s1101_s9 + $0x20] sm:$0xff]  ;;  %v287_v6 = vld [vmem:[%s1101_s9 + $0x28] sm:$0xff]  ;;  %582 = vmatpush.msra.mxu1 %v575_v11 }
  0x10   : > { %v288_v7 = vld [vmem:[%s1101_s9 + $0x30] sm:$0xff]  ;;  %v289_v8 = vld [vmem:[%s1101_s9 + $0x38] sm:$0xff]  ;;  %v290_v9 = vld [vmem:[%s1101_s9 + $0x40] sm:$0xff]  ;;  %992 = vmatpush.msrb.mxu3 %v575_v11 }
  0x11   : > { %v291_v13 = vld [vmem:[%s1101_s9 + $0x48] sm:$0xff]  ;;  %583 = vmatpush.msra.mxu1 %v574_v12  ;;  %v292_v18 = vld [vmem:[%s1101_s9 + $0x50] sm:$0xff]  ;;  %v568_v20 = vld [vmem:[%s1419_s3 + $0x38] sm:$0xff] }
  0x12   : > { %993 = vmatpush.msrb.mxu3 %v574_v12  ;;  %v567_v21 = vld [vmem:[%s1419_s3 + $0x30] sm:$0xff]  ;;  %v566_v22 = vld [vmem:[%s1419_s3 + $0x28] sm:$0xff]  ;;  %v293_v23 = vld [vmem:[%s1101_s9 + $0x58] sm:$0xff] }
  0x13   : > { %584 = vmatpush.msra.mxu1 %v573_v14  ;;  %v565_v24 = vld [vmem:[%s1419_s3 + $0x20] sm:$0xff]  ;;  %v564_v25 = vld [vmem:[%s1419_s3 + $0x18] sm:$0xff]  ;;  %v563_v26 = vld [vmem:[%s1419_s3 + $0x10] sm:$0xff] }
  0x14   : > { %994 = vmatpush.msrb.mxu3 %v573_v14  ;;  %v294_v27 = vld [vmem:[%s1101_s9 + $0x60] sm:$0xff]  ;;  %v562_v28 = vld [vmem:[%s1419_s3 + $0x8] sm:$0xff]  ;;  %v296_v31 = vld [vmem:[%s1101_s9 + $0x70] sm:$0xff] }
  0x15   : > { %585 = vmatpush.msra.mxu1 %v572_v15  ;;  %v561_v29 = vld [vmem:[%s1419_s3] sm:$0xff]  ;;  %v295_v30 = vld [vmem:[%s1101_s9 + $0x68] sm:$0xff]  ;;  %v297_v32 = vld [vmem:[%s1101_s9 + $0x78] sm:$0xff] }
  0x16   : > { %995 = vmatpush.msrb.mxu3 %v572_v15  ;;  %v1186_v33 = vld [vmem:[%s1418_s2] ss:$0 sm:$0xff]  ;;  %v299_v39 = vld [vmem:[%s1101_s9 + $0x88] sm:$0xff]  ;;  %v300_v43 = vld [vmem:[%s1101_s9 + $0x90] sm:$0xff] }
  0x17   : > { %957 = vmatmul.msk.f32.gmra.mxu0 %vm319_vm0, %v283_v2  ;;  %586 = vmatpush.msra.mxu1 %v571_v16  ;;  %v298_v35 = vld [vmem:[%s1101_s9 + $0x80] sm:$0xff]  ;;  %v301_v47 = vld [vmem:[%s1101_s9 + $0x98] sm:$0xff]  ;;  %v303_v55 = vld [vmem:[%s1101_s9 + $0xa8] sm:$0xff] }
  0x18   : > { %996 = vmatpush.msrb.mxu3 %v571_v16  ;;  %v302_v51 = vld [vmem:[%s1101_s9 + $0xa0] sm:$0xff]  ;;  %v308_v58 = vld [vmem:[%s1101_s9 + $0xd0] sm:$0xff]  ;;  %v309_v63 = vld [vmem:[%s1101_s9 + $0xd8] sm:$0xff] }
  0x19   : > { %587 = vmatpush.msra.mxu1 %v570_v17  ;;  %982 = vmatmul.msk.f32.vlgmr.msra.gmra.mxu3 %vm319_vm0, %v308_v58  ;;  %v304_v60 = vld [vmem:[%s1101_s9 + $0xb0] sm:$0xff]  ;;  %v305_v1 = vld [vmem:[%s1101_s9 + $0xb8] sm:$0xff]  ;;  %v307_v12 = vld [vmem:[%s1101_s9 + $0xc8] sm:$0xff] }
  0x1a   : > { %997 = vmatpush.msrb.mxu3 %v570_v17  ;;  %v741_v10 = vld [vmem:[%s1421_s5 + $0x78] sm:$0xff]  ;;  %v740_v14 = vld [vmem:[%s1421_s5 + $0x70] sm:$0xff]  ;;  %v739_v16 = vld [vmem:[%s1421_s5 + $0x68] sm:$0xff] }
  0x1b   : > { %588 = vmatpush.msra.mxu1 %v569_v19  ;;  %746 = vmatpush.msra.mxu2 %v741_v10  ;;  %v312_v17 = vld [vmem:[%s1101_s9 + $0xf0] sm:$0xff] }
  0x1c   : > { %998 = vmatpush.msrb.mxu3 %v569_v19  ;;  %v737_v19 = vld [vmem:[%s1421_s5 + $0x58] sm:$0xff] }
  0x1d   : > { %589 = vmatpush.msra.mxu1 %v568_v20  ;;  %747 = vmatpush.msra.mxu2 %v740_v14 }
  0x1e   : > { %999 = vmatpush.msrb.mxu3 %v568_v20 }
  0x1f   : > { %958 = vmatmul.msk.f32.gmra.mxu0 %vm319_vm0, %v284_v3  ;;  %590 = vmatpush.msra.mxu1 %v567_v21 }
  0x20   : > { %1000 = vmatpush.msrb.mxu3 %v567_v21  ;;  %748 = vmatpush.msra.mxu2 %v739_v16 }
  0x21   : > { %591 = vmatpush.msra.mxu1 %v566_v22  ;;  %983 = vmatmul.msk.f32.gmra.mxu3 %vm319_vm0, %v309_v63 }
  0x22   : > { %1001 = vmatpush.msrb.mxu3 %v566_v22  ;;  %v736_v22 = vld [vmem:[%s1421_s5 + $0x50] sm:$0xff] }
  0x23   : > { %592 = vmatpush.msra.mxu1 %v565_v24 }
  0x24   : > { %1002 = vmatpush.msrb.mxu3 %v565_v24  ;;  %v735_v24 = vld [vmem:[%s1421_s5 + $0x48] sm:$0xff] }
  0x25   : > { %593 = vmatpush.msra.mxu1 %v564_v25 }
  0x26   : > { %1003 = vmatpush.msrb.mxu3 %v564_v25  ;;  %v313_v25 = vld [vmem:[%s1101_s9 + $0xf8] sm:$0xff] }
  0x27   : > { %959 = vmatmul.msk.f32.gmra.mxu0 %vm319_vm0, %v285_v4  ;;  %594 = vmatpush.msra.mxu1 %v563_v26  ;;  %v310_v4 = vld [vmem:[%s1101_s9 + $0xe0] sm:$0xff] }
  0x28   : > { %1004 = vmatpush.msrb.mxu3 %v563_v26  ;;  %v734_v26 = vld [vmem:[%s1421_s5 + $0x40] sm:$0xff] }
  0x29   : > { %595 = vmatpush.msra.mxu1 %v562_v28  ;;  %984 = vmatmul.msk.f32.gmra.mxu3 %vm319_vm0, %v310_v4 }
  0x2a   : > { %1005 = vmatpush.msrb.mxu3 %v562_v28 }
  0x2b   : > { %596 = vmatpush.msra.mxu1 %v561_v29 }
  0x2c   : > { %1006 = vmatpush.msrb.mxu3 %v561_v29 }
  0x2e   : > { %1007 = vmatpush.msra.mxu3 %v741_v10 }
  0x2f   : > { %960 = vmatmul.msk.f32.gmra.mxu0 %vm319_vm0, %v286_v5 }
  0x30   : > { %1008 = vmatpush.msra.mxu3 %v740_v14 }
  0x32   : > { %1009 = vmatpush.msra.mxu3 %v739_v16 }
  0x37   : > { %961 = vmatmul.msk.f32.gmra.mxu0 %vm319_vm0, %v287_v6  ;;  %v306_v6 = vld [vmem:[%s1101_s9 + $0xc0] sm:$0xff] }
  0x3f   : > { %962 = vmatmul.msk.f32.gmra.mxu0 %vm319_vm0, %v288_v7 }
  0x47   : > { %963 = vmatmul.msk.f32.gmra.mxu0 %vm319_vm0, %v289_v8 }
  0x4f   : > { %964 = vmatmul.msk.f32.gmra.mxu0 %vm319_vm0, %v290_v9  ;;  %v311_v9 = vld [vmem:[%s1101_s9 + $0xe8] sm:$0xff]  ;;  %s1332_s9 = scalar_lea.vmem %s1423_s7, %s953_s29 }
  0x50   : > { %985 = vmatmul.msk.f32.gmra.mxu3 %vm319_vm0, %v311_v9 }
  0x57   : > { %965 = vmatmul.msk.f32.gmra.mxu0 %vm319_vm0, %v291_v13 }
  0x58   : > { %986 = vmatmul.msk.f32.gmra.mxu3 %vm319_vm0, %v312_v17 }
  0x5f   : > { %966 = vmatmul.msk.f32.gmra.mxu0 %vm319_vm0, %v292_v18  ;;  %v738_v18 = vld [vmem:[%s1421_s5 + $0x60] sm:$0xff] }
  0x60   : > { %749 = vmatpush.msra.mxu2 %v738_v18  ;;  %1010 = vmatpush.msra.mxu3 %v738_v18 }
  0x61   : > { %987 = vmatmul.msk.f32.gmra.mxu3 %vm319_vm0, %v313_v25 }
  0x62   : > { %750 = vmatpush.msra.mxu2 %v737_v19  ;;  %1011 = vmatpush.msra.mxu3 %v737_v19 }
  0x64   : > { %751 = vmatpush.msra.mxu2 %v736_v22  ;;  %1012 = vmatpush.msra.mxu3 %v736_v22 }
  0x66   : > { %752 = vmatpush.msra.mxu2 %v735_v24  ;;  %1013 = vmatpush.msra.mxu3 %v735_v24 }
  0x67   : > { %967 = vmatmul.msk.f32.gmra.mxu0 %vm319_vm0, %v293_v23 }
  0x68   : > { %753 = vmatpush.msra.mxu2 %v734_v26  ;;  %1014 = vmatpush.msra.mxu3 %v734_v26 }
  0x6f   : > { %968 = vmatmul.msk.f32.gmra.mxu0 %vm319_vm0, %v294_v27  ;;  %v733_v27 = vld [vmem:[%s1421_s5 + $0x38] sm:$0xff] }
  0x70   : > { %754 = vmatpush.msra.mxu2 %v733_v27  ;;  %1015 = vmatpush.msra.mxu3 %v733_v27 }
  0x77   : > { %969 = vmatmul.msk.f32.gmra.mxu0 %vm319_vm0, %v295_v30  ;;  %v732_v30 = vld [vmem:[%s1421_s5 + $0x30] sm:$0xff] }
  0x78   : > { %755 = vmatpush.msra.mxu2 %v732_v30  ;;  %1016 = vmatpush.msra.mxu3 %v732_v30 }
  0x7f   : > { %970 = vmatmul.msk.f32.gmra.mxu0 %vm319_vm0, %v296_v31 }
  0x87   : > { %971 = vmatmul.msk.f32.gmra.mxu0 %vm319_vm0, %v297_v32  ;;  %v731_v32 = vld [vmem:[%s1421_s5 + $0x28] sm:$0xff] }
  0x88   : > { %756 = vmatpush.msra.mxu2 %v731_v32  ;;  %1017 = vmatpush.msra.mxu3 %v731_v32 }
  0x8c   : > { %v433_v34 = vpop.f32.mrf.mxu0 }
  0x8d   : > { %v434_v36 = vadd.f32 %v1186_v33, %v433_v34  ;;  %v730_v34 = vld [vmem:[%s1421_s5 + $0x20] sm:$0xff] }
  0x8e   : > { %757 = vmatpush.msra.mxu2 %v730_v34  ;;  %1018 = vmatpush.msra.mxu3 %v730_v34 }
  0x8f   : > { %972 = vmatmul.msk.f32.gmra.mxu0 %vm319_vm0, %v298_v35  ;;  %v529_v37 = vmax.f32 %v434_v36, 0.0  ;;  %v729_v35 = vld [vmem:[%s1421_s5 + $0x18] sm:$0xff] }
  0x90   : > { %758 = vmatpush.msra.mxu2 %v729_v35  ;;  %1019 = vmatpush.msra.mxu3 %v729_v35 }
  0x91   : > { %597 = vmatmul.f32.vlgmr.msra.gmra.mxu1 %v529_v37 }
  0x94   : > { %v436_v38 = vpop.f32.mrf.mxu0 }
  0x95   : > { %v437_v40 = vadd.f32 %v1186_v33, %v436_v38  ;;  %v728_v38 = vld [vmem:[%s1421_s5 + $0x10] sm:$0xff] }
  0x96   : > { %759 = vmatpush.msra.mxu2 %v728_v38  ;;  %1020 = vmatpush.msra.mxu3 %v728_v38 }
  0x97   : > { %973 = vmatmul.msk.f32.gmra.mxu0 %vm319_vm0, %v299_v39  ;;  %v530_v41 = vmax.f32 %v437_v40, 0.0  ;;  %v727_v40 = vld [vmem:[%s1421_s5 + $0x8] sm:$0xff] }
  0x98   : > { %760 = vmatpush.msra.mxu2 %v727_v40  ;;  %1021 = vmatpush.msra.mxu3 %v727_v40 }
  0x99   : > { %600 = vmatmul.f32.gmra.mxu1 %v530_v41  ;;  %v726_v41 = vld [vmem:[%s1421_s5] sm:$0xff] }
  0x9a   : > { %761 = vmatpush.msra.mxu2 %v726_v41  ;;  %1022 = vmatpush.msra.mxu3 %v726_v41 }
  0x9c   : > { %v439_v42 = vpop.f32.mrf.mxu0  ;;  %v511_v38 = vpop.f32.mrf.mxu3 }
  0x9d   : > { %v440_v44 = vadd.f32 %v1186_v33, %v439_v42 }
  0x9f   : > { %v531_v45 = vmax.f32 %v440_v44, 0.0  ;;  %974 = vmatmul.msk.f32.gmra.mxu0 %vm319_vm0, %v300_v43 }
  0xa1   : > { %603 = vmatmul.f32.gmra.mxu1 %v531_v45 }
  0xa4   : > { %v442_v46 = vpop.f32.mrf.mxu0 }
  0xa5   : > { %v443_v48 = vadd.f32 %v1186_v33, %v442_v46 }
  0xa7   : > { %v532_v49 = vmax.f32 %v443_v48, 0.0  ;;  %975 = vmatmul.msk.f32.gmra.mxu0 %vm319_vm0, %v301_v47 }
  0xa9   : > { %606 = vmatmul.f32.gmra.mxu1 %v532_v49 }
  0xac   : > { %v445_v50 = vpop.f32.mrf.mxu0 }
  0xad   : > { %v446_v52 = vadd.f32 %v1186_v33, %v445_v50 }
  0xaf   : > { %v533_v53 = vmax.f32 %v446_v52, 0.0  ;;  %976 = vmatmul.msk.f32.gmra.mxu0 %vm319_vm0, %v302_v51  ;;  %v1287_v51 = vld [vmem:[%s1420_s4] ss:$0 sm:$0xff] }
  0xb1   : > { %609 = vmatmul.f32.gmra.mxu1 %v533_v53 }
  0xb4   : > { %v448_v54 = vpop.f32.mrf.mxu0 }
  0xb5   : > { %v449_v56 = vadd.f32 %v1186_v33, %v448_v54 }
  0xb7   : > { %v534_v57 = vmax.f32 %v449_v56, 0.0  ;;  %977 = vmatmul.msk.f32.gmra.mxu0 %vm319_vm0, %v303_v55 }
  0xb9   : > { %612 = vmatmul.f32.gmra.mxu1 %v534_v57 }
  0xbc   : > { %v451_v59 = vpop.f32.mrf.mxu0 }
  0xbd   : > { %v452_v61 = vadd.f32 %v1186_v33, %v451_v59 }
  0xbf   : > { %v535_v62 = vmax.f32 %v452_v61, 0.0  ;;  %978 = vmatmul.msk.f32.gmra.mxu0 %vm319_vm0, %v304_v60 }
  0xc1   : > { %615 = vmatmul.f32.gmra.mxu1 %v535_v62 }
  0xc4   : > { %v454_v0 = vpop.f32.mrf.mxu0 }
  0xc5   : > { %v455_v2 = vadd.f32 %v1186_v33, %v454_v0 }
  0xc7   : > { %v536_v3 = vmax.f32 %v455_v2, 0.0  ;;  %979 = vmatmul.msk.f32.gmra.mxu0 %vm319_vm0, %v305_v1 }
  0xc9   : > { %618 = vmatmul.f32.gmra.mxu1 %v536_v3 }
  0xcc   : > { %v457_v5 = vpop.f32.mrf.mxu0 }
  0xcd   : > { %v458_v7 = vadd.f32 %v1186_v33, %v457_v5 }
  0xcf   : > { %v537_v8 = vmax.f32 %v458_v7, 0.0  ;;  %980 = vmatmul.msk.f32.gmra.mxu0 %vm319_vm0, %v306_v6 }
  0xd1   : > { %621 = vmatmul.f32.gmra.mxu1 %v537_v8 }
  0xd4   : > { %v460_v11 = vpop.f32.mrf.mxu0 }
  0xd5   : > { %v461_v13 = vadd.f32 %v1186_v33, %v460_v11 }
  0xd7   : > { %v538_v15 = vmax.f32 %v461_v13, 0.0  ;;  %981 = vmatmul.msk.f32.gmra.mxu0 %vm319_vm0, %v307_v12 }
  0xd9   : > { %624 = vmatmul.f32.gmra.mxu1 %v538_v15 }
  0xdc   : > { %v463_v20 = vpop.f32.mrf.mxu0 }
  0xdd   : > { %v464_v21 = vadd.f32 %v1186_v33, %v463_v20 }
  0xdf   : > { %v539_v23 = vmax.f32 %v464_v21, 0.0 }
  0xe1   : > { %627 = vmatmul.f32.gmra.mxu1 %v539_v23 }
  0xe4   : > { %v466_v28 = vpop.f32.mrf.mxu0 }
  0xe5   : > { %v467_v29 = vadd.f32 %v1186_v33, %v466_v28 }
  0xe7   : > { %v540_v31 = vmax.f32 %v467_v29, 0.0 }
  0xe9   : > { %630 = vmatmul.f32.gmra.mxu1 %v540_v31 }
  0xec   : > { %v469_v36 = vpop.f32.mrf.mxu0 }
  0xed   : > { %v470_v37 = vadd.f32 %v1186_v33, %v469_v36 }
  0xef   : > { %v541_v39 = vmax.f32 %v470_v37, 0.0 }
  0xf1   : > { %633 = vmatmul.f32.gmra.mxu1 %v541_v39 }
  0xf4   : > { %v472_v42 = vpop.f32.mrf.mxu0 }
  0xf5   : > { %v473_v43 = vadd.f32 %v1186_v33, %v472_v42 }
  0xf7   : > { %v542_v44 = vmax.f32 %v473_v43, 0.0 }
  0xf9   : > { %636 = vmatmul.f32.gmra.mxu1 %v542_v44 }
  0xfc   : > { %v475_v45 = vpop.f32.mrf.mxu0 }
  0xfd   : > { %v476_v46 = vadd.f32 %v1186_v33, %v475_v45 }
  0xff   : > { %v543_v47 = vmax.f32 %v476_v46, 0.0 }
 0x101   : > { %639 = vmatmul.f32.gmra.mxu1 %v543_v47  ;;  %v514_v47 = vpop.f32.mrf.mxu3 }
 0x104   : > { %v478_v48 = vpop.f32.mrf.mxu0 }
 0x105   : > { %v479_v49 = vadd.f32 %v1186_v33, %v478_v48 }
 0x107   : > { %v544_v50 = vmax.f32 %v479_v49, 0.0 }
 0x109   : > { %642 = vmatmul.f32.gmra.mxu1 %v544_v50 }
 0x10c   : > { %v481_v52 = vpop.f32.mrf.mxu0 }
 0x10d   : > { %v482_v53 = vadd.f32 %v1186_v33, %v481_v52  ;;  %v512_v52 = vadd.f32 %v1186_v33, %v511_v38 }
 0x10e   : > { %v598_v54 = vpop.f32.mrf.mxu1 }
 0x10f   : > { %v545_v55 = vmax.f32 %v482_v53, 0.0  ;;  %v599_v56 = vadd.f32 %v1287_v51, %v598_v54  ;;  %v555_v53 = vmax.f32 %v512_v52, 0.0 }
 0x111   : > { %v694_v57 = vmax.f32 %v599_v56, 0.0  ;;  %645 = vmatmul.f32.gmra.mxu1 %v545_v55  ;;  %v517_v56 = vpop.f32.mrf.mxu3 }
 0x113   : > { %762 = vmatmul.f32.vlgmr.msra.gmra.mxu2 %v694_v57 }
 0x114   : > { %v484_v58 = vpop.f32.mrf.mxu0 }
 0x115   : > { %v485_v59 = vadd.f32 %v1186_v33, %v484_v58  ;;  %v515_v58 = vadd.f32 %v1186_v33, %v514_v47 }
 0x116   : > { %v601_v60 = vpop.f32.mrf.mxu1 }
 0x117   : > { %v546_v61 = vmax.f32 %v485_v59, 0.0  ;;  %v602_v62 = vadd.f32 %v1287_v51, %v601_v60  ;;  %v556_v59 = vmax.f32 %v515_v58, 0.0 }
 0x119   : > { %v695_v63 = vmax.f32 %v602_v62, 0.0  ;;  %648 = vmatmul.f32.gmra.mxu1 %v546_v61 }
 0x11b   : > { %765 = vmatmul.f32.gmra.mxu2 %v695_v63  ;;  %v518_v63 = vadd.f32 %v1186_v33, %v517_v56 }
 0x11c   : > { %v487_v0 = vpop.f32.mrf.mxu0 }
 0x11d   : > { %v488_v1 = vadd.f32 %v1186_v33, %v487_v0  ;;  %v520_v0 = vpop.f32.mrf.mxu3 }
 0x11e   : > { %v604_v2 = vpop.f32.mrf.mxu1 }
 0x11f   : > { %v547_v3 = vmax.f32 %v488_v1, 0.0  ;;  %v605_v4 = vadd.f32 %v1287_v51, %v604_v2  ;;  %v557_v1 = vmax.f32 %v518_v63, 0.0 }
 0x121   : > { %v696_v5 = vmax.f32 %v605_v4, 0.0  ;;  %651 = vmatmul.f32.gmra.mxu1 %v547_v3 }
 0x123   : > { %768 = vmatmul.f32.gmra.mxu2 %v696_v5  ;;  %v521_v5 = vadd.f32 %v1186_v33, %v520_v0 }
 0x124   : > { %v490_v6 = vpop.f32.mrf.mxu0 }
 0x125   : > { %v491_v7 = vadd.f32 %v1186_v33, %v490_v6  ;;  %v523_v6 = vpop.f32.mrf.mxu3 }
 0x126   : > { %v607_v8 = vpop.f32.mrf.mxu1 }
 0x127   : > { %v548_v9 = vmax.f32 %v491_v7, 0.0  ;;  %v608_v10 = vadd.f32 %v1287_v51, %v607_v8  ;;  %v558_v7 = vmax.f32 %v521_v5, 0.0 }
 0x129   : > { %v697_v11 = vmax.f32 %v608_v10, 0.0  ;;  %654 = vmatmul.f32.gmra.mxu1 %v548_v9 }
 0x12b   : > { %771 = vmatmul.f32.gmra.mxu2 %v697_v11  ;;  %v524_v11 = vadd.f32 %v1186_v33, %v523_v6 }
 0x12c   : > { %v493_v12 = vpop.f32.mrf.mxu0 }
 0x12d   : > { %v494_v13 = vadd.f32 %v1186_v33, %v493_v12  ;;  %v559_v12 = vmax.f32 %v524_v11, 0.0 }
 0x12e   : > { %v610_v14 = vpop.f32.mrf.mxu1 }
 0x12f   : > { %v549_v15 = vmax.f32 %v494_v13, 0.0  ;;  %v611_v16 = vadd.f32 %v1287_v51, %v610_v14  ;;  %v526_v14 = vpop.f32.mrf.mxu3 }
 0x131   : > { %v698_v17 = vmax.f32 %v611_v16, 0.0  ;;  %657 = vmatmul.f32.gmra.mxu1 %v549_v15 }
 0x133   : > { %774 = vmatmul.f32.gmra.mxu2 %v698_v17  ;;  %v527_v17 = vadd.f32 %v1186_v33, %v526_v14 }
 0x134   : > { %v496_v18 = vpop.f32.mrf.mxu0 }
 0x135   : > { %v497_v19 = vadd.f32 %v1186_v33, %v496_v18  ;;  %v560_v18 = vmax.f32 %v527_v17, 0.0 }
 0x136   : > { %v613_v20 = vpop.f32.mrf.mxu1 }
 0x137   : > { %v550_v21 = vmax.f32 %v497_v19, 0.0  ;;  %v614_v22 = vadd.f32 %v1287_v51, %v613_v20 }
 0x139   : > { %v699_v23 = vmax.f32 %v614_v22, 0.0  ;;  %660 = vmatmul.f32.gmra.mxu1 %v550_v21 }
 0x13b   : > { %777 = vmatmul.f32.gmra.mxu2 %v699_v23 }
 0x13c   : > { %v499_v24 = vpop.f32.mrf.mxu0 }
 0x13d   : > { %v500_v25 = vadd.f32 %v1186_v33, %v499_v24 }
 0x13e   : > { %v616_v26 = vpop.f32.mrf.mxu1 }
 0x13f   : > { %v551_v27 = vmax.f32 %v500_v25, 0.0  ;;  %v617_v28 = vadd.f32 %v1287_v51, %v616_v26  ;;  %v1325_v25 = vld [vmem:[%s1422_s6] ss:$0 sm:$0xff] }
 0x141   : > { %v700_v29 = vmax.f32 %v617_v28, 0.0  ;;  %663 = vmatmul.f32.gmra.mxu1 %v551_v27 }
 0x143   : > { %780 = vmatmul.f32.gmra.mxu2 %v700_v29 }
 0x144   : > { %v502_v30 = vpop.f32.mrf.mxu0 }
 0x145   : > { %v503_v31 = vadd.f32 %v1186_v33, %v502_v30 }
 0x146   : > { %v619_v32 = vpop.f32.mrf.mxu1 }
 0x147   : > { %v552_v34 = vmax.f32 %v503_v31, 0.0  ;;  %v620_v35 = vadd.f32 %v1287_v51, %v619_v32 }
 0x149   : > { %v701_v36 = vmax.f32 %v620_v35, 0.0  ;;  %666 = vmatmul.f32.vlgmr.msrb.gmra.mxu3 %v552_v34 }
 0x14b   : > { %783 = vmatmul.f32.gmra.mxu2 %v701_v36 }
 0x14c   : > { %v505_v37 = vpop.f32.mrf.mxu0 }
 0x14d   : > { %v506_v39 = vadd.f32 %v1186_v33, %v505_v37 }
 0x14e   : > { %v622_v40 = vpop.f32.mrf.mxu1 }
 0x14f   : > { %v553_v41 = vmax.f32 %v506_v39, 0.0  ;;  %v623_v42 = vadd.f32 %v1287_v51, %v622_v40 }
 0x151   : > { %v702_v43 = vmax.f32 %v623_v42, 0.0  ;;  %669 = vmatmul.f32.gmra.mxu3 %v553_v41 }
 0x153   : > { %786 = vmatmul.f32.gmra.mxu2 %v702_v43 }
 0x154   : > { %v508_v44 = vpop.f32.mrf.mxu0 }
 0x155   : > { %v509_v45 = vadd.f32 %v1186_v33, %v508_v44 }
 0x156   : > { %v625_v46 = vpop.f32.mrf.mxu1 }
 0x157   : > { %v554_v48 = vmax.f32 %v509_v45, 0.0  ;;  %v626_v49 = vadd.f32 %v1287_v51, %v625_v46 }
 0x159   : > { %v703_v50 = vmax.f32 %v626_v49, 0.0  ;;  %672 = vmatmul.f32.gmra.mxu3 %v554_v48 }
 0x15b   : > { %789 = vmatmul.f32.gmra.mxu2 %v703_v50 }
 0x15e   : > { %v628_v54 = vpop.f32.mrf.mxu1 }
 0x15f   : > { %v629_v55 = vadd.f32 %v1287_v51, %v628_v54 }
 0x161   : > { %v704_v57 = vmax.f32 %v629_v55, 0.0  ;;  %675 = vmatmul.f32.gmra.mxu3 %v555_v53 }
 0x163   : > { %792 = vmatmul.f32.gmra.mxu2 %v704_v57 }
 0x166   : > { %v631_v60 = vpop.f32.mrf.mxu1 }
 0x167   : > { %v632_v61 = vadd.f32 %v1287_v51, %v631_v60 }
 0x169   : > { %v705_v62 = vmax.f32 %v632_v61, 0.0  ;;  %678 = vmatmul.f32.gmra.mxu3 %v556_v59 }
 0x16b   : > { %795 = vmatmul.f32.gmra.mxu2 %v705_v62 }
 0x16e   : > { %v634_v2 = vpop.f32.mrf.mxu1 }
 0x16f   : > { %v635_v3 = vadd.f32 %v1287_v51, %v634_v2 }
 0x171   : > { %v706_v4 = vmax.f32 %v635_v3, 0.0  ;;  %681 = vmatmul.f32.gmra.mxu3 %v557_v1 }
 0x173   : > { %798 = vmatmul.f32.gmra.mxu2 %v706_v4 }
 0x176   : > { %v637_v8 = vpop.f32.mrf.mxu1 }
 0x177   : > { %v638_v9 = vadd.f32 %v1287_v51, %v637_v8 }
 0x179   : > { %v707_v10 = vmax.f32 %v638_v9, 0.0  ;;  %684 = vmatmul.f32.gmra.mxu3 %v558_v7 }
 0x17b   : > { %801 = vmatmul.f32.gmra.mxu2 %v707_v10 }
 0x17e   : > { %v640_v13 = vpop.f32.mrf.mxu1 }
 0x17f   : > { %v641_v15 = vadd.f32 %v1287_v51, %v640_v13 }
 0x181   : > { %v708_v16 = vmax.f32 %v641_v15, 0.0  ;;  %687 = vmatmul.f32.gmra.mxu3 %v559_v12 }
 0x183   : > { %804 = vmatmul.f32.gmra.mxu2 %v708_v16 }
 0x186   : > { %v643_v19 = vpop.f32.mrf.mxu1 }
 0x187   : > { %v644_v20 = vadd.f32 %v1287_v51, %v643_v19 }
 0x189   : > { %v709_v21 = vmax.f32 %v644_v20, 0.0  ;;  %690 = vmatmul.f32.gmra.mxu3 %v560_v18 }
 0x18b   : > { %807 = vmatmul.f32.gmra.mxu2 %v709_v21 }
 0x18e   : > { %v646_v22 = vpop.f32.mrf.mxu1 }
 0x18f   : > { %v647_v23 = vadd.f32 %v1287_v51, %v646_v22 }
 0x191   : > { %v710_v24 = vmax.f32 %v647_v23, 0.0 }
 0x193   : > { %810 = vmatmul.f32.gmra.mxu2 %v710_v24 }
 0x196   : > { %v649_v26 = vpop.f32.mrf.mxu1  ;;  %v763_v33 = vpop.f32.mrf.mxu2 }
 0x197   : > { %v650_v27 = vadd.f32 %v1287_v51, %v649_v26  ;;  %v764_v28 = vadd.f32 %v1325_v25, %v763_v33 }
 0x199   : > { %v711_v29 = vmax.f32 %v650_v27, 0.0  ;;  %859 = vst [vmem:[%s1332_s9] sm:$0xff] %v764_v28 }
 0x19b   : > { %813 = vmatmul.f32.gmra.mxu2 %v711_v29 }
 0x19e   : > { %v652_v30 = vpop.f32.mrf.mxu1  ;;  %v766_v31 = vpop.f32.mrf.mxu2 }
 0x19f   : > { %v653_v32 = vadd.f32 %v1287_v51, %v652_v30  ;;  %v767_v34 = vadd.f32 %v1325_v25, %v766_v31 }
 0x1a1   : > { %v712_v35 = vmax.f32 %v653_v32, 0.0  ;;  %860 = vst [vmem:[%s1332_s9 + $0x8] sm:$0xff] %v767_v34 }
 0x1a3   : > { %816 = vmatmul.f32.gmra.mxu2 %v712_v35 }
 0x1a6   : > { %v655_v36 = vpop.f32.mrf.mxu1  ;;  %v769_v37 = vpop.f32.mrf.mxu2 }
 0x1a7   : > { %v656_v38 = vadd.f32 %v1287_v51, %v655_v36  ;;  %v770_v39 = vadd.f32 %v1325_v25, %v769_v37 }
 0x1a9   : > { %v713_v40 = vmax.f32 %v656_v38, 0.0  ;;  %861 = vst [vmem:[%s1332_s9 + $0x10] sm:$0xff] %v770_v39 }
 0x1ab   : > { %819 = vmatmul.f32.gmra.mxu2 %v713_v40 }
 0x1ae   : > { %v658_v41 = vpop.f32.mrf.mxu1  ;;  %v772_v42 = vpop.f32.mrf.mxu2 }
 0x1af   : > { %v659_v43 = vadd.f32 %v1287_v51, %v658_v41  ;;  %v773_v44 = vadd.f32 %v1325_v25, %v772_v42 }
 0x1b1   : > { %v714_v45 = vmax.f32 %v659_v43, 0.0  ;;  %862 = vst [vmem:[%s1332_s9 + $0x18] sm:$0xff] %v773_v44 }
 0x1b3   : > { %822 = vmatmul.f32.gmra.mxu2 %v714_v45 }
 0x1b6   : > { %v661_v46 = vpop.f32.mrf.mxu1  ;;  %v775_v47 = vpop.f32.mrf.mxu2 }
 0x1b7   : > { %v662_v48 = vadd.f32 %v1287_v51, %v661_v46  ;;  %v776_v49 = vadd.f32 %v1325_v25, %v775_v47 }
 0x1b9   : > { %v715_v50 = vmax.f32 %v662_v48, 0.0  ;;  %863 = vst [vmem:[%s1332_s9 + $0x20] sm:$0xff] %v776_v49 }
 0x1bb   : > { %825 = vmatmul.f32.gmra.mxu2 %v715_v50 }
 0x1be   : > { %v664_v52 = vpop.f32.mrf.mxu1  ;;  %v778_v53 = vpop.f32.mrf.mxu2 }
 0x1bf   : > { %v665_v54 = vadd.f32 %v1287_v51, %v664_v52  ;;  %v779_v55 = vadd.f32 %v1325_v25, %v778_v53 }
 0x1c1   : > { %v716_v56 = vmax.f32 %v665_v54, 0.0  ;;  %864 = vst [vmem:[%s1332_s9 + $0x28] sm:$0xff] %v779_v55 }
 0x1c3   : > { %828 = vmatmul.f32.gmra.mxu2 %v716_v56 }
 0x1c6   : > { %v781_v57 = vpop.f32.mrf.mxu2 }
 0x1c7   : > { %v782_v58 = vadd.f32 %v1325_v25, %v781_v57 }
 0x1c9   : > { %865 = vst [vmem:[%s1332_s9 + $0x30] sm:$0xff] %v782_v58 }
 0x1cc   : > { %v667_v59 = vpop.f32.mrf.mxu3 }
 0x1cd   : > { %v668_v60 = vadd.f32 %v1287_v51, %v667_v59 }
 0x1ce   : > { %v784_v61 = vpop.f32.mrf.mxu2 }
 0x1cf   : > { %v717_v62 = vmax.f32 %v668_v60, 0.0  ;;  %v785_v63 = vadd.f32 %v1325_v25, %v784_v61 }
 0x1d1   : > { %866 = vst [vmem:[%s1332_s9 + $0x38] sm:$0xff] %v785_v63  ;;  %831 = vmatmul.f32.vlgmr.msra.gmra.mxu3 %v717_v62 }
 0x1d4   : > { %v670_v0 = vpop.f32.mrf.mxu3 }
 0x1d5   : > { %v671_v1 = vadd.f32 %v1287_v51, %v670_v0 }
 0x1d6   : > { %v787_v2 = vpop.f32.mrf.mxu2 }
 0x1d7   : > { %v718_v3 = vmax.f32 %v671_v1, 0.0  ;;  %v788_v4 = vadd.f32 %v1325_v25, %v787_v2 }
 0x1d9   : > { %867 = vst [vmem:[%s1332_s9 + $0x40] sm:$0xff] %v788_v4  ;;  %834 = vmatmul.f32.gmra.mxu3 %v718_v3 }
 0x1dc   : > { %v673_v5 = vpop.f32.mrf.mxu3 }
 0x1dd   : > { %v674_v6 = vadd.f32 %v1287_v51, %v673_v5 }
 0x1de   : > { %v790_v7 = vpop.f32.mrf.mxu2 }
 0x1df   : > { %v719_v8 = vmax.f32 %v674_v6, 0.0  ;;  %v791_v9 = vadd.f32 %v1325_v25, %v790_v7 }
 0x1e1   : > { %868 = vst [vmem:[%s1332_s9 + $0x48] sm:$0xff] %v791_v9  ;;  %837 = vmatmul.f32.gmra.mxu3 %v719_v8 }
 0x1e4   : > { %v676_v10 = vpop.f32.mrf.mxu3 }
 0x1e5   : > { %v677_v11 = vadd.f32 %v1287_v51, %v676_v10 }
 0x1e6   : > { %v793_v12 = vpop.f32.mrf.mxu2 }
 0x1e7   : > { %v720_v13 = vmax.f32 %v677_v11, 0.0  ;;  %v794_v14 = vadd.f32 %v1325_v25, %v793_v12 }
 0x1e9   : > { %869 = vst [vmem:[%s1332_s9 + $0x50] sm:$0xff] %v794_v14  ;;  %840 = vmatmul.f32.gmra.mxu3 %v720_v13 }
 0x1ec   : > { %v679_v15 = vpop.f32.mrf.mxu3 }
 0x1ed   : > { %v680_v16 = vadd.f32 %v1287_v51, %v679_v15 }
 0x1ee   : > { %v796_v17 = vpop.f32.mrf.mxu2 }
 0x1ef   : > { %v721_v18 = vmax.f32 %v680_v16, 0.0  ;;  %v797_v19 = vadd.f32 %v1325_v25, %v796_v17 }
 0x1f1   : > { %870 = vst [vmem:[%s1332_s9 + $0x58] sm:$0xff] %v797_v19  ;;  %843 = vmatmul.f32.gmra.mxu3 %v721_v18 }
 0x1f4   : > { %v682_v20 = vpop.f32.mrf.mxu3 }
 0x1f5   : > { %v683_v21 = vadd.f32 %v1287_v51, %v682_v20 }
 0x1f6   : > { %v799_v22 = vpop.f32.mrf.mxu2 }
 0x1f7   : > { %v722_v23 = vmax.f32 %v683_v21, 0.0  ;;  %v800_v24 = vadd.f32 %v1325_v25, %v799_v22 }
 0x1f9   : > { %871 = vst [vmem:[%s1332_s9 + $0x60] sm:$0xff] %v800_v24  ;;  %846 = vmatmul.f32.gmra.mxu3 %v722_v23 }
 0x1fc   : > { %v685_v26 = vpop.f32.mrf.mxu3 }
 0x1fd   : > { %v686_v33 = vadd.f32 %v1287_v51, %v685_v26 }
 0x1fe   : > { %v802_v27 = vpop.f32.mrf.mxu2 }
 0x1ff   : > { %v723_v28 = vmax.f32 %v686_v33, 0.0  ;;  %v803_v29 = vadd.f32 %v1325_v25, %v802_v27 }
 0x201   : > { %872 = vst [vmem:[%s1332_s9 + $0x68] sm:$0xff] %v803_v29  ;;  %849 = vmatmul.f32.gmra.mxu3 %v723_v28 }
 0x204   : > { %v688_v30 = vpop.f32.mrf.mxu3 }
 0x205   : > { %v689_v31 = vadd.f32 %v1287_v51, %v688_v30 }
 0x206   : > { %v805_v32 = vpop.f32.mrf.mxu2 }
 0x207   : > { %v724_v34 = vmax.f32 %v689_v31, 0.0  ;;  %v806_v35 = vadd.f32 %v1325_v25, %v805_v32 }
 0x209   : > { %873 = vst [vmem:[%s1332_s9 + $0x70] sm:$0xff] %v806_v35  ;;  %852 = vmatmul.f32.gmra.mxu3 %v724_v34 }
 0x20c   : > { %v691_v36 = vpop.f32.mrf.mxu3 }
 0x20d   : > { %v692_v37 = vadd.f32 %v1287_v51, %v691_v36 }
 0x20e   : > { %v808_v38 = vpop.f32.mrf.mxu2 }
 0x20f   : > { %v725_v39 = vmax.f32 %v692_v37, 0.0  ;;  %v809_v40 = vadd.f32 %v1325_v25, %v808_v38 }
 0x211   : > { %874 = vst [vmem:[%s1332_s9 + $0x78] sm:$0xff] %v809_v40  ;;  %855 = vmatmul.f32.gmra.mxu3 %v725_v39 }
 0x216   : > { %v811_v41 = vpop.f32.mrf.mxu2 }
 0x217   : > { %v812_v42 = vadd.f32 %v1325_v25, %v811_v41 }
 0x219   : > { %875 = vst [vmem:[%s1332_s9 + $0x80] sm:$0xff] %v812_v42 }
 0x21e   : > { %v814_v43 = vpop.f32.mrf.mxu2 }
 0x21f   : > { %v815_v44 = vadd.f32 %v1325_v25, %v814_v43 }
 0x221   : > { %876 = vst [vmem:[%s1332_s9 + $0x88] sm:$0xff] %v815_v44 }
 0x226   : > { %v817_v45 = vpop.f32.mrf.mxu2 }
 0x227   : > { %v818_v51 = vadd.f32 %v1325_v25, %v817_v45 }
 0x229   : > { %877 = vst [vmem:[%s1332_s9 + $0x90] sm:$0xff] %v818_v51 }
 0x22e   : > { %v820_v46 = vpop.f32.mrf.mxu2 }
 0x22f   : > { %v821_v47 = vadd.f32 %v1325_v25, %v820_v46 }
 0x231   : > { %878 = vst [vmem:[%s1332_s9 + $0x98] sm:$0xff] %v821_v47 }
 0x236   : > { %v823_v48 = vpop.f32.mrf.mxu2 }
 0x237   : > { %v824_v49 = vadd.f32 %v1325_v25, %v823_v48 }
 0x239   : > { %879 = vst [vmem:[%s1332_s9 + $0xa0] sm:$0xff] %v824_v49 }
 0x23e   : > { %v826_v50 = vpop.f32.mrf.mxu2 }
 0x23f   : > { %v827_v52 = vadd.f32 %v1325_v25, %v826_v50 }
 0x241   : > { %880 = vst [vmem:[%s1332_s9 + $0xa8] sm:$0xff] %v827_v52 }
 0x246   : > { %v829_v53 = vpop.f32.mrf.mxu2 }
 0x247   : > { %v830_v54 = vadd.f32 %v1325_v25, %v829_v53 }
 0x249   : > { %881 = vst [vmem:[%s1332_s9 + $0xb0] sm:$0xff] %v830_v54 }
 0x254   : > { %v832_v55 = vpop.f32.mrf.mxu3 }
 0x255   : > { %v833_v56 = vadd.f32 %v1325_v25, %v832_v55 }
 0x257   : > { %882 = vst [vmem:[%s1332_s9 + $0xb8] sm:$0xff] %v833_v56 }
 0x25c   : > { %v835_v57 = vpop.f32.mrf.mxu3 }
 0x25d   : > { %v836_v58 = vadd.f32 %v1325_v25, %v835_v57 }
 0x25f   : > { %883 = vst [vmem:[%s1332_s9 + $0xc0] sm:$0xff] %v836_v58 }
 0x264   : > { %v838_v59 = vpop.f32.mrf.mxu3 }
 0x265   : > { %v839_v60 = vadd.f32 %v1325_v25, %v838_v59 }
 0x267   : > { %884 = vst [vmem:[%s1332_s9 + $0xc8] sm:$0xff] %v839_v60 }
 0x26c   : > { %v841_v61 = vpop.f32.mrf.mxu3 }
 0x26d   : > { %v842_v62 = vadd.f32 %v1325_v25, %v841_v61 }
 0x26f   : > { %885 = vst [vmem:[%s1332_s9 + $0xd0] sm:$0xff] %v842_v62 }
 0x274   : > { %v844_v63 = vpop.f32.mrf.mxu3 }
 0x275   : > { %v845_v0 = vadd.f32 %v1325_v25, %v844_v63 }
 0x277   : > { %886 = vst [vmem:[%s1332_s9 + $0xd8] sm:$0xff] %v845_v0 }
 0x27c   : > { %v847_v1 = vpop.f32.mrf.mxu3 }
 0x27d   : > { %v848_v2 = vadd.f32 %v1325_v25, %v847_v1 }
 0x27f   : > { %887 = vst [vmem:[%s1332_s9 + $0xe0] sm:$0xff] %v848_v2 }
 0x284   : > { %v850_v3 = vpop.f32.mrf.mxu3 }
 0x285   : > { %v851_v4 = vadd.f32 %v1325_v25, %v850_v3 }
 0x287   : > { %888 = vst [vmem:[%s1332_s9 + $0xe8] sm:$0xff] %v851_v4 }
 0x28c   : > { %v853_v5 = vpop.f32.mrf.mxu3 }
 0x28d   : > { %v854_v6 = vadd.f32 %v1325_v25, %v853_v5 }
 0x28f   : > { %889 = vst [vmem:[%s1332_s9 + $0xf0] sm:$0xff] %v854_v6 }
 0x294   : > { %v856_v7 = vpop.f32.mrf.mxu3 }
 0x295   : > { %v857_v8 = vadd.f32 %v1325_v25, %v856_v7 }
 0x297   : > { %890 = vst [vmem:[%s1332_s9 + $0xf8] sm:$0xff] %v857_v8 }
 0x298 PF: > { %s17_s24 = sadd.s32 1, %s1040_s24  }
 0x299   : > { %p14_p4 = scmp.ge.s32.totalorder %s17_s24, 4  }
 0x29b   :  { %16 = sbr.rel (!%p14_p4) target bundleno = 1 (0x1), region = 78 }

</bundles_post_ra>
